<compile_context>
chip_gen: v7x
topology: tpu7x:2x2x1
jax: 0.10.0
libtpu: 0.0.40
codegen_flags: <defaults>
</compile_context>

<pallas_src>
import functools

import jax
import jax.numpy as jnp
from jax.experimental import pallas as pl
from jax.experimental.pallas import tpu as pltpu

NUM_AFFORDANCES = 6


def _round_up(x, m):
    return ((x + m - 1) // m) * m


def affordance_kernel(img_ref, w_ref, b_ref, out_ref, acc_ref, *, inv_hw):
    # img_ref: (n_tile, C, hw_tile)   w_ref: (C, A)   b_ref: (1, A)
    # out_ref: (n_tile, A)            acc_ref: (n_tile, C) f32 scratch
    hw_step = pl.program_id(1)

    @pl.when(hw_step == 0)
    def _():
        acc_ref[...] = jnp.zeros_like(acc_ref)

    # Streamed partial spatial sum (mean factor 1/HW is applied at finalize).
    x = img_ref[...].astype(jnp.float32)
    acc_ref[...] += jnp.sum(x, axis=-1)

    @pl.when(hw_step == pl.num_programs(1) - 1)
    def _():
        feat = acc_ref[...] * inv_hw              # (n_tile, C) global average pool
        n_tile, c = feat.shape
        a = w_ref.shape[1]
        w = w_ref[...].astype(jnp.float32)
        bias = b_ref[...].astype(jnp.float32)
        if c <= 16:
            # Tiny contraction: unrolled VPU broadcast-MACs; skip the MXU.
            logits = jnp.broadcast_to(bias, (n_tile, a))
            for cc in range(c):
                logits = logits + feat[:, cc:cc + 1] * w[cc:cc + 1, :]
        else:
            # Realistic feature dim: unpadded matmul on the MXU.
            logits = jnp.dot(feat, w, preferred_element_type=jnp.float32) + bias
        out_ref[...] = jax.nn.sigmoid(logits).astype(out_ref.dtype)


def affordance_predictor(img, w, b, *, hw_tile=2048):
    """img: (N, C, H, W) f32/bf16 (NCHW, like PyTorch). Returns (N, A) f32."""
    n, c, h, wd = img.shape
    a = w.shape[1]
    hw = h * wd
    x = img.reshape(n, c, hw)

    # Lane tile over the flattened spatial axis: multiple of 128, capped at HW.
    tile = _round_up(min(hw_tile, _round_up(hw, 128)), 128)
    hw_padded = _round_up(hw, tile)
    if hw_padded != hw:
        # Zero padding is neutral for the running sum (we divide by true HW).
        x = jnp.pad(x, ((0, 0), (0, 0), (0, hw_padded - hw)))

    n_tile = n if n <= 8 else 8
    grid = (pl.cdiv(n, n_tile), hw_padded // tile)

    b2 = b.reshape(1, a)
    kernel = functools.partial(affordance_kernel, inv_hw=1.0 / float(hw))

    return pl.pallas_call(
        kernel,
        out_shape=jax.ShapeDtypeStruct((n, a), jnp.float32),
        grid_spec=pltpu.PrefetchScalarGridSpec(
            num_scalar_prefetch=0,
            grid=grid,
            in_specs=[
                pl.BlockSpec((n_tile, c, tile), lambda i, k: (i, 0, k)),  # image stream
                pl.BlockSpec((c, a), lambda i, k: (0, 0)),                # weight (resident)
                pl.BlockSpec((1, a), lambda i, k: (0, 0)),                # bias (resident)
            ],
            out_specs=pl.BlockSpec((n_tile, a), lambda i, k: (i, 0)),
            scratch_shapes=[pltpu.VMEM((n_tile, c), jnp.float32)],
        ),
        compiler_params=pltpu.CompilerParams(
            # batch axis 'parallel' (v7x dual-TC sharding), HW reduction 'arbitrary'
            dimension_semantics=("parallel", "arbitrary"),
        ),
    )(x, w, b2)


if __name__ == "__main__":
    key = jax.random.PRNGKey(0)
    k_img, k_w, k_b = jax.random.split(key, 3)

    N, C, H, W = 2, 4, 16, 16
    img = jax.random.normal(k_img, (N, C, H, W), dtype=jnp.float32)

    # Deterministic synthetic parameters for the stand-in affordance head.
    w = jax.random.normal(k_w, (C, NUM_AFFORDANCES), dtype=jnp.float32) * 0.1
    b = jax.random.normal(k_b, (NUM_AFFORDANCES,), dtype=jnp.float32) * 0.1

    # hw_tile=128 here so the tiny demo exercises a multi-step (grid=2)
    # reduction + accumulator path; the production default is 2048-wide tiles.
    out = affordance_predictor(img, w, b, hw_tile=128)
    out = jax.block_until_ready(out)

    # Pure-JAX reference of the same head.
    ref = jax.nn.sigmoid(jnp.mean(img.reshape(N, C, H * W), axis=-1) @ w + b)
    assert out.shape == (N, NUM_AFFORDANCES)
    assert jnp.allclose(out, ref, atol=1e-5, rtol=1e-5)

    print("KERNEL_OK")
</pallas_src>

<mosaic_0001>
module attributes {stable_mosaic.version = 11 : i64} {
  func.func @affordance_kernel(%arg0: i32, %arg1: i32, %arg2: memref<2x4x128xf32, #tpu.memory_space<vmem>>, %arg3: memref<4x6xf32, #tpu.memory_space<vmem>>, %arg4: memref<1x6xf32, #tpu.memory_space<vmem>>, %arg5: memref<2x6xf32, #tpu.memory_space<vmem>>, %arg6: memref<2x4xf32, #tpu.memory_space<vmem>>) attributes {dimension_semantics = [#tpu.dimension_semantics<parallel>, #tpu.dimension_semantics<arbitrary>], iteration_bounds = array<i64: 1, 2>, scalar_prefetch = 0 : i64, scratch_operands = 1 : i64, tpu.core_type = #tpu.core_type<tc>, window_params = [{transform_indices = @transform_0, window_bounds = array<i64: 2, 4, 128>}, {pipeline_mode = #tpu.pipeline_mode<synchronous>, transform_indices = @transform_1, window_bounds = array<i64: 4, 6>}, {pipeline_mode = #tpu.pipeline_mode<synchronous>, transform_indices = @transform_2, window_bounds = array<i64: 1, 6>}, {transform_indices = @transform_3, window_bounds = array<i64: 2, 6>}]} {
    %c0_i32 = arith.constant 0 : i32
    %0 = arith.cmpi eq, %arg1, %c0_i32 : i32
    %1 = arith.extui %0 : i1 to i32
    %c0_i32_0 = arith.constant 0 : i32
    %2 = arith.cmpi ne, %1, %c0_i32_0 : i32
    scf.if %2 {
      %cst_8 = arith.constant 0.000000e+00 : f32
      %11 = vector.broadcast %cst_8 : f32 to vector<2x4xf32>
      %c0_9 = arith.constant 0 : index
      %c0_10 = arith.constant 0 : index
      %12 = vector.load %arg6[%c0_9, %c0_10] : memref<2x4xf32, #tpu.memory_space<vmem>>, vector<2x4xf32>
      tpu.vector_store %arg6[%c0_9, %c0_10], %11 {strides = array<i32>} : memref<2x4xf32, #tpu.memory_space<vmem>>, vector<2x4xf32>,
    } else {
    }
    %c0 = arith.constant 0 : index
    %c0_1 = arith.constant 0 : index
    %c0_2 = arith.constant 0 : index
    %3 = vector.load %arg2[%c0, %c0_1, %c0_2] : memref<2x4x128xf32, #tpu.memory_space<vmem>>, vector<2x4x128xf32>
    %c0_3 = arith.constant 0 : index
    %c0_4 = arith.constant 0 : index
    %4 = vector.load %arg6[%c0_3, %c0_4] : memref<2x4xf32, #tpu.memory_space<vmem>>, vector<2x4xf32>
    %cst = arith.constant dense<0.000000e+00> : vector<2x4xf32>
    %5 = vector.multi_reduction <add>, %3, %cst [2] : vector<2x4x128xf32> to vector<2x4xf32>
    %6 = arith.addf %4, %5 : vector<2x4xf32>
    %c0_5 = arith.constant 0 : index
    %c0_6 = arith.constant 0 : index
    %7 = vector.load %arg6[%c0_5, %c0_6] : memref<2x4xf32, #tpu.memory_space<vmem>>, vector<2x4xf32>
    tpu.vector_store %arg6[%c0_5, %c0_6], %6 {strides = array<i32>} : memref<2x4xf32, #tpu.memory_space<vmem>>, vector<2x4xf32>,
    %c1_i32 = arith.constant 1 : i32
    %8 = arith.cmpi eq, %arg1, %c1_i32 : i32
    %9 = arith.extui %8 : i1 to i32
    %c0_i32_7 = arith.constant 0 : i32
    %10 = arith.cmpi ne, %9, %c0_i32_7 : i32
    scf.if %10 {
      %c0_8 = arith.constant 0 : index
      %c0_9 = arith.constant 0 : index
      %11 = vector.load %arg6[%c0_8, %c0_9] : memref<2x4xf32, #tpu.memory_space<vmem>>, vector<2x4xf32>
      %cst_10 = arith.constant 3.906250e-03 : f32
      %12 = vector.broadcast %cst_10 : f32 to vector<2x4xf32>
      %13 = arith.mulf %11, %12 : vector<2x4xf32>
      %c0_11 = arith.constant 0 : index
      %c0_12 = arith.constant 0 : index
      %14 = vector.load %arg3[%c0_11, %c0_12] : memref<4x6xf32, #tpu.memory_space<vmem>>, vector<4x6xf32>
      %c0_13 = arith.constant 0 : index
      %c0_14 = arith.constant 0 : index
      %15 = vector.load %arg4[%c0_13, %c0_14] : memref<1x6xf32, #tpu.memory_space<vmem>>, vector<1x6xf32>
      %16 = vector.shape_cast %15 : vector<1x6xf32> to vector<1x6xf32>
      %17 = vector.broadcast %16 : vector<1x6xf32> to vector<2x6xf32>
      %18 = vector.extract_strided_slice %13 {offsets = [0, 0], sizes = [2, 1], strides = [1, 1]} : vector<2x4xf32> to vector<2x1xf32>
      %19 = vector.extract_strided_slice %14 {offsets = [0, 0], sizes = [1, 6], strides = [1, 1]} : vector<4x6xf32> to vector<1x6xf32>
      %20 = vector.broadcast %18 : vector<2x1xf32> to vector<2x6xf32>
      %21 = vector.broadcast %19 : vector<1x6xf32> to vector<2x6xf32>
      %22 = arith.mulf %20, %21 : vector<2x6xf32>
      %23 = arith.addf %17, %22 : vector<2x6xf32>
      %24 = vector.extract_strided_slice %13 {offsets = [0, 1], sizes = [2, 1], strides = [1, 1]} : vector<2x4xf32> to vector<2x1xf32>
      %25 = vector.extract_strided_slice %14 {offsets = [1, 0], sizes = [1, 6], strides = [1, 1]} : vector<4x6xf32> to vector<1x6xf32>
      %26 = vector.broadcast %24 : vector<2x1xf32> to vector<2x6xf32>
      %27 = vector.broadcast %25 : vector<1x6xf32> to vector<2x6xf32>
      %28 = arith.mulf %26, %27 : vector<2x6xf32>
      %29 = arith.addf %23, %28 : vector<2x6xf32>
      %30 = vector.extract_strided_slice %13 {offsets = [0, 2], sizes = [2, 1], strides = [1, 1]} : vector<2x4xf32> to vector<2x1xf32>
      %31 = vector.extract_strided_slice %14 {offsets = [2, 0], sizes = [1, 6], strides = [1, 1]} : vector<4x6xf32> to vector<1x6xf32>
      %32 = vector.broadcast %30 : vector<2x1xf32> to vector<2x6xf32>
      %33 = vector.broadcast %31 : vector<1x6xf32> to vector<2x6xf32>
      %34 = arith.mulf %32, %33 : vector<2x6xf32>
      %35 = arith.addf %29, %34 : vector<2x6xf32>
      %36 = vector.extract_strided_slice %13 {offsets = [0, 3], sizes = [2, 1], strides = [1, 1]} : vector<2x4xf32> to vector<2x1xf32>
      %37 = vector.extract_strided_slice %14 {offsets = [3, 0], sizes = [1, 6], strides = [1, 1]} : vector<4x6xf32> to vector<1x6xf32>
      %38 = vector.broadcast %36 : vector<2x1xf32> to vector<2x6xf32>
      %39 = vector.broadcast %37 : vector<1x6xf32> to vector<2x6xf32>
      %40 = arith.mulf %38, %39 : vector<2x6xf32>
      %41 = arith.addf %35, %40 : vector<2x6xf32>
      %42 = arith.negf %41 : vector<2x6xf32>
      %43 = math.exp %42 : vector<2x6xf32>
      %cst_15 = arith.constant 1.000000e+00 : f32
      %44 = vector.broadcast %cst_15 : f32 to vector<2x6xf32>
      %45 = arith.addf %44, %43 : vector<2x6xf32>
      %46 = arith.divf %44, %45 : vector<2x6xf32>
      %c0_16 = arith.constant 0 : index
      %c0_17 = arith.constant 0 : index
      %47 = vector.load %arg5[%c0_16, %c0_17] : memref<2x6xf32, #tpu.memory_space<vmem>>, vector<2x6xf32>
      tpu.vector_store %arg5[%c0_16, %c0_17], %46 {strides = array<i32>} : memref<2x6xf32, #tpu.memory_space<vmem>>, vector<2x6xf32>,
    } else {
    }
    return
  }
  func.func @transform_0(%arg0: i32, %arg1: i32) -> (i32, i32, i32) {
    %c0_i32 = arith.constant 0 : i32
    %c0_i32_0 = arith.constant 0 : i32
    return %arg0, %c0_i32, %arg1 : i32, i32, i32
  }
  func.func @transform_1(%arg0: i32, %arg1: i32) -> (i32, i32) {
    %c0_i32 = arith.constant 0 : i32
    %c0_i32_0 = arith.constant 0 : i32
    %c0_i32_1 = arith.constant 0 : i32
    return %c0_i32, %c0_i32_0 : i32, i32
  }
  func.func @transform_2(%arg0: i32, %arg1: i32) -> (i32, i32) {
    %c0_i32 = arith.constant 0 : i32
    %c0_i32_0 = arith.constant 0 : i32
    %c0_i32_1 = arith.constant 0 : i32
    return %c0_i32, %c0_i32_0 : i32, i32
  }
  func.func @transform_3(%arg0: i32, %arg1: i32) -> (i32, i32) {
    %c0_i32 = arith.constant 0 : i32
    %c0_i32_0 = arith.constant 0 : i32
    return %arg0, %c0_i32 : i32, i32
  }
}

</mosaic_0001>

<bundles_post_ra>
// kernel: tpu_custom_call.1
= control target key start
LH: loop header
LB: loop body
LE: loop exit
PB: predicated region body
PF: predicated region fallthrough
CT: control target
= control target key end

     0   :  { %8 = vsyncpa [#allocation4], 0  ;;  %s867_s0 = inlined_call_operand.hbm [shape: f32[2,4,256], index: 0, kind: input, shape index: {}]   ;;  %s868_s1 = inlined_call_operand.hbm [shape: f32[4,6], index: 1, kind: input, shape index: {}]   ;;  %s869_s2 = inlined_call_operand.vmem [shape: f32[1,6], index: 2, kind: input, shape index: {}]   ;;  %s870_s3 = inlined_call_operand.hbm [shape: f32[2,6], index: 3, kind: output, shape index: {}]  }
   0x1   :  { %10 = vsyncpa [#allocation4 + $0x1], 0 }
   0x2   :  { %11 = vsyncpa [#allocation7], 0 }
   0x3   :  { %12 = vsyncpa [#allocation5], 0  ;;  %s673_s12 = smov 0   ;;  %s675_s13 = smov 0  }
   0x4   :  { %s677_s14 = smov 0   ;;  %s679_s15 = smov 0  }
   0x5   :  { %s681_s16 = smov 0   ;;  %s683_s17 = smov 0  }
   0x6 LB: > { %s391_s18 = sadd.s32 4294967295, %s640_s17   ;;  %s39_s19 = sadd.s32 1, %s628_s14  ;;  %s640_s17 = sphi %s683_s17, %s18_s17   ;;  %s636_s16 = sphi %s681_s16, %s890_s16   ;;  %s632_s15 = sphi %s679_s15, %s889_s15   ;;  %s628_s14 = sphi %s677_s14, %s888_s14   ;;  %s624_s13 = sphi %s675_s13, %s887_s13   ;;  %s620_s12 = sphi %s673_s12, %s886_s12  }
   0x7   : > { %p46_p0 = scmp.ne.s32.totalorder %s628_s14, %s624_s13  ;;  %p47_p1 = scmp.eq.s32.totalorder %s640_s17, 0 }
   0x8   : > { %p52_p2 = scmp.ne.s32.totalorder %s624_s13, %s620_s12  ;;  %p709_p3 = scmp.eq.s32.totalorder %s391_s18, 0 }
   0x9   : > { %p48_p4 = por %p47_p1, %p46_p0  ;;  %p392_p5 = scmp.ge.s32.totalorder %s640_s17, 1 }
   0xa   : > { %s876_s20 = scalar_select %p709_p3, 1, 0 }
   0xb   : > { %p716_p6 = por %p709_p3, %p52_p2  ;;  %p131_p7 = scmp.lt.s32.totalorder %s640_s17, 3 }
   0xc   : > { %s642_s23 = smov [#allocation6]   ;;  %p427_p10 = scmp.lt.s32.totalorder %s640_s17, 2 }
   0xd   : > { %s877_s21 = scalar_select %p716_p6, 1, 0 }
   0xe   : > { %p721_p8 = pnand %p392_p5, %p131_p7  ;;  %s144_s24 = sshll.u32 %s642_s23, 4  ;;  %s145_s24 = int_to_ptr.vmem [resolvable:$true] %s144_s24 }
   0xf   : > { %s158_s25 = sand.u32 1, %s628_s14   ;;  %p735_p12 = pnand %p427_p10, %p48_p4 }
  0x10   : > { %s878_s22 = scalar_select %p721_p8, 1, 0 }
  0x11   : > { %p418_p9 = pneg %p721_p8  ;;  %s498_s30 = scalar_lea.hbm %s868_s1, 64 }
  0x12   : > { %s880_s27 = scalar_select %p735_p12, 1, 0 }
  0x13   : > { %p731_p11 = pnand %p418_p9, %p709_p3  ;;  %p499_p13 = scmp.ne.s32.totalorder %s868_s1, %s498_s30 }
  0x14   : > { %p505_p5 = scmp.lt.u32.totalorder %s498_s30, %s868_s1 }
  0x15   : > { %p500_p0 = pneg %p731_p11 }
  0x17   : > { %p501_p1 = pnand %p500_p0, %p499_p13 }
  0x19   : > { %p502_p2 = pneg %p501_p1 }
  0x1b   : > { %p507_p4 = pnand %p505_p5, %p502_p2 }
  0x1d   : > { %510 = shalt.err (!%p507_p4)
}
  0x1e   : > { %s511_s8 = scalar_lea.vmem %s145_s24, 64  ;;  %p519_p3 = scmp.lt.s32.totalorder %s145_s24, %s145_s24 }
  0x1f   : > { %p512_p7 = scmp.ne.s32.totalorder %s145_s24, %s511_s8  ;;  %p520_p6 = scmp.lt.s32.totalorder %s511_s8, %s511_s8 }
  0x21   : > { %p514_p9 = pnand %p512_p7, %p500_p0  ;;  %p521_p8 = por %p520_p6, %p519_p3 }
  0x23   : > { %p515_p10 = pneg %p514_p9 }
  0x25   : > { %p522_p12 = pnand %p521_p8, %p515_p10 }
  0x27   : > { %525 = shalt.err (!%p522_p12)
}
  0x28   : > { %421 = dma.hbm_to_vmem [thread:$0]  (!%p731_p11), %s868_s1, 64, %s145_s24, [#allocation7]  }
  0x29   : > { %s27_s11 = sadd.s32 1, %s636_s16  ;;  %s395_s12 = sshll.u32 %s158_s25, 3 }
  0x2a   : > { %p28_p3 = scmp.ge.s32.totalorder %s27_s11, 2  ;;  %s396_s23 = sshll.u32 %s636_s16, 6 }
  0x2b   : > { %s162_s28 = scalar_lea.vmem [#allocation3], %s395_s12  ;;  %s764_s4 = scalar_lea.hbm %s867_s0, %s396_s23 }
  0x2c   : > { %s171_s26 = sshll.u32 %s162_s28, 4  ;;  %s892_s11 = smov (%p28_p3, %s27_s11), 0  ;;  %s766_s26 = int_to_ptr.vmem [resolvable:$true] %s171_s26 }
  0x2d   : > { %s35_s24 = ssub.s32 %s636_s16, %s892_s11  ;;  %s777_s6 = scalar_lea.sflag [#allocation4], %s158_s25 }
  0x2e   : > { %p37_p6 = scmp.eq.s32.totalorder %s35_s24, 0  ;;  %s526_s7 = scalar_lea.hbm %s764_s4, 128 }
  0x2f   : > { %p527_p8 = scmp.ne.s32.totalorder %s764_s4, %s526_s7  ;;  %p881_p11 = scmp.ne.s32.totalorder %s880_s27, 0 }
  0x30   : > { %s773_s5 = scalar_select %p37_p6, %s628_s14, %s39_s19  }
  0x31   : > { %p528_p12 = pneg %p881_p11  ;;  %s531_s10 = scalar_lea.hbm %s867_s0, 256 }
  0x32   : > { %p532_p1 = scmp.lt.u32.totalorder %s764_s4, %s867_s0  ;;  %p533_p2 = scmp.lt.u32.totalorder %s531_s10, %s526_s7 }
  0x33   : > { %p529_p13 = pnand %p528_p12, %p527_p8  ;;  %p535_p4 = scmp.lt.u32.totalorder %s526_s7, %s764_s4 }
  0x34   : > { %p534_p5 = por %p533_p2, %p532_p1 }
  0x35   : > { %p530_p0 = pneg %p529_p13 }
  0x36   : > { %p536_p7 = por %p535_p4, %p534_p5 }
  0x38   : > { %p537_p9 = pnand %p536_p7, %p530_p0 }
  0x3a   : > { %540 = shalt.err (!%p537_p9)
}
  0x3b   : > { %s541_s19 = scalar_lea.vmem %s766_s26, 128  ;;  %s643_s25 = smov [#allocation3]  }
  0x3c   : > { %p542_p10 = scmp.ne.s32.totalorder %s766_s26, %s541_s19  ;;  %s546_s28 = sshll.u32 %s643_s25, 4  ;;  %s547_s28 = int_to_ptr.vmem [resolvable:$false] %s546_s28 }
  0x3d   : > { %s548_s29 = scalar_lea.vmem %s547_s28, 256  ;;  %p549_p8 = scmp.lt.s32.totalorder %s766_s26, %s547_s28 }
  0x3e   : > { %p544_p3 = pnand %p542_p10, %p528_p12  ;;  %p550_p13 = scmp.lt.s32.totalorder %s548_s29, %s541_s19 }
  0x40   : > { %p545_p6 = pneg %p544_p3  ;;  %p551_p1 = por %p550_p13, %p549_p8 }
  0x42   : > { %p552_p2 = pnand %p551_p1, %p545_p6 }
  0x44   : > { %555 = shalt.err (!%p552_p2)
}
  0x45   : > { %s644_s30 = smov 128   ;;  %s645_s24 = smov 64  }
  0x46   : > { %s646_s7 = smov 4   ;;  %p882_p12 = scmp.ne.s32.totalorder %s878_s22, 0 }
  0x47   : > { %425 = dma.hbm_to_vmem [thread:$0]  (!%p881_p11), %s764_s4, 128, %s766_s26, %s777_s6, %s644_s30, %s645_s24, %s646_s7  }
  0x48   : > { %183 = sbr.rel (%p882_p12) target bundleno = 448 (0x1c0), region = 32  ;;  %s185_s8 = sand.u32 (!%p882_p12), 1, %s624_s13  }
  0x49   : > { %s398_s9 = sshll.u32 (!%p882_p12), %s185_s8, 3  ;;  %s186_s10 = scalar_lea.sflag (!%p882_p12), [#allocation4], %s185_s8 }
  0x4a   : > { %s189_s12 = scalar_lea.vmem (!%p882_p12), [#allocation3], %s398_s9  ;;  %p883_p0 = scmp.ne.s32.totalorder (!%p882_p12), %s877_s21, 0 }
  0x4f   : > { %607 = dma.done.wait (%p883_p0), %s186_s10, 128  }
  0x50   : > { %609 = vsyncadd (%p883_p0), %s186_s10, 4294967168  ;;  %p884_p5 = scmp.ne.s32.totalorder %s876_s20, 0 }
  0x52   : > { %611 = dma.done.wait (%p884_p5), [#allocation7], 64  }
  0x53   : > { %613 = vsyncadd (%p884_p5), [#allocation7], 4294967232  ;;  %p400_p11 = scmp.ne.s32.totalorder %s632_s15, 0 }
  0x54   : > { %vm216_vm0 = vcmask (!%p400_p11), 25600   ;;  %v647_v0 = vmov (!%p400_p11), 0.0  }
  0x55   : > { %215 = sbr.rel (%p400_p11) target bundleno = 92 (0x5c), region = 44  ;;  %217 = vst.msk [vmem:[#allocation2] sm:$0x3] (!%p400_p11), %vm216_vm0, %v647_v0 }
  0x5c PF: > { %v218_v1 = vld [vmem:[%s189_s12] sm:$0xf]  ;;  %vm221_vm1 = vcmask 1043456   ;;  %v219_v2 = vld [vmem:[%s189_s12 + $0x4] sm:$0xf]  ;;  %v230_v5 = vlaneseq  ;;  %vm240_vm2 = vcmask 1041409  }
  0x5d   : > { %v222_v3 = vsel %vm221_vm1, %v218_v1, 0.0  ;;  %v225_v4 = vsel %vm221_vm1, %v219_v2, 0.0  ;;  %v220_v12 = vld [vmem:[#allocation2] sm:$0x3]  ;;  %vm244_vm3 = vcmask 25600   ;;  %p401_p4 = scmp.ne.s32.totalorder %s632_s15, 1 }
  0x5e   : > { %223 = vadd.xlane.f32.xlu0 %v222_v3  ;;  %v231_v6 = vand.u32 127, %v230_v5  ;;  %v233_v7 = vshrl.u32 %v230_v5, 7  ;;  %v648_v17 = vmov (!%p401_p4), 0   ;;  %v649_v19 = vmov (!%p401_p4), 2   ;;  %v252_v23 = vld [vmem:[#allocation6] sm:$0xf] (!%p401_p4) }
  0x5f   : > { %489 = vset.pattern.permute.xlu0 (!%p401_p4), %v648_v17  ;;  %491 = vset.pattern.permute.xlu1 (!%p401_p4), %v649_v19  ;;  %v650_v20 = vmov (!%p401_p4), 1   ;;  %v651_v21 = vmov (!%p401_p4), 3   ;;  %v402_v32 = vld [vmem:[%s869_s2] ss:$0 sm:$0xff] (!%p401_p4)  ;;  %vm307_vm4 = vcmask (!%p401_p4), 41984  }
  0x60   : > { %v234_v9 = vsub.s32 %v231_v6, %v233_v7  ;;  %v267_v22 = vsub.s32 (!%p401_p4), 0, %v233_v7  ;;  %v277_v25 = vsub.s32 (!%p401_p4), 1, %v233_v7  ;;  %v287_v27 = vsub.s32 (!%p401_p4), 2, %v233_v7 }
  0x61   : > { %v297_v29 = vsub.s32 (!%p401_p4), 3, %v233_v7 }
  0x62   : > { %226 = vadd.xlane.f32.xlu0 %v225_v4  ;;  %v268_v24 = vrot.slane (!%p401_p4), %v252_v23, %v267_v22  ;;  %v278_v31 = vrot.slane (!%p401_p4), %v252_v23, %v277_v25  ;;  %v288_v33 = vrot.slane (!%p401_p4), %v252_v23, %v287_v27 }
  0x63   : > { %v298_v34 = vrot.slane (!%p401_p4), %v252_v23, %v297_v29 }
  0xeb   : > { %v224_v8 = vpop.xlane.xlu0 %223 }
  0xec   : > { %v235_v11 = vrot.slane %v224_v8, %v234_v9 }
  0xef   : > { %v227_v10 = vpop.xlane.xlu0 %226  ;;  %249 = sbr.rel (%p401_p4) target bundleno = 423 (0x1a7), region = 48 }
  0xf0   : > { %v239_v13 = vrot.slane %v227_v10, %v234_v9 }
  0xf2   : > { %v241_v14 = vsel %vm240_vm2, %v239_v13, %v235_v11 }
  0xf3   : > { %v243_v15 = vadd.f32 %v241_v14, %v220_v12 }
  0xf5   : > { %245 = vst.msk [vmem:[#allocation2] sm:$0x3] %vm244_vm3, %v243_v15 }
  0xfc   : > { %v250_v16 = vld [vmem:[#allocation2] sm:$0x3] }
  0xfd   : > { %v251_v18 = vmul.f32 0.00390625, %v250_v16 }
  0xff   : > { %262 = vperm.xlu0 %489, %v251_v18   ;;  %282 = vperm.xlu1 %491, %v251_v18  }
 0x103   : > { %490 = vset.pattern.permute.xlu0 %v650_v20  ;;  %492 = vset.pattern.permute.xlu1 %v651_v21 }
 0x104   : > { %272 = vperm.xlu0 %490, %v251_v18   ;;  %292 = vperm.xlu1 %492, %v251_v18  }
 0x108   : > { %493 = vset.pattern.permute.xlu0 %v651_v21 }
 0x17e   : > { %v263_v26 = vpop.permute.xlu0 %262  ;;  %v283_v28 = vpop.permute.xlu1 %282 }
 0x17f   : > { %v269_v30 = vmul.f32 %v268_v24, %v263_v26  ;;  %v289_v39 = vmul.f32 %v288_v33, %v283_v28 }
 0x181   : > { %v270_v37 = vadd.f32 %v402_v32, %v269_v30 }
 0x183   : > { %v273_v35 = vpop.permute.xlu0 %272  ;;  %v293_v36 = vpop.permute.xlu1 %292 }
 0x184   : > { %v279_v38 = vmul.f32 %v278_v31, %v273_v35  ;;  %v299_v41 = vmul.f32 %v298_v34, %v293_v36 }
 0x186   : > { %v280_v40 = vadd.f32 %v279_v38, %v270_v37 }
 0x188   : > { %v290_v42 = vadd.f32 %v289_v39, %v280_v40 }
 0x18a   : > { %v300_v43 = vadd.f32 %v299_v41, %v290_v42 }
 0x18c   : > { %v403_v44 = vmul.f32 -1.442695, %v300_v43 }
 0x18e   : > { %494 = vpow2.f32 %v403_v44 }
 0x198   : > { %v495_v45 = vpop.eup %494 }
 0x199   : > { %v304_v46 = vadd.f32 1.0, %v495_v45 }
 0x19b   : > { %496 = vrcp.f32 %v304_v46 }
 0x1a5   : > { %v497_v47 = vpop.eup %496 }
 0x1a6   : > { %308 = vst.msk [vmem:[#allocation8] sm:$0x3] %vm307_vm4, %v497_v47 }
 0x1a7 PF: > { %p823_p7 = scmp.eq.s32.totalorder %s391_s18, 1  ;;  %s652_s22 = smov [#allocation8]  }
 0x1a8   : > { %s318_s27 = sshll.u32 %s652_s22, 4  ;;  %s319_s27 = int_to_ptr.vmem [resolvable:$true] %s318_s27 }
 0x1a9   : > { %s556_s26 = scalar_lea.vmem %s319_s27, 32  ;;  %p563_p6 = scmp.lt.s32.totalorder %s319_s27, %s319_s27 }
 0x1aa   : > { %p557_p9 = scmp.ne.s32.totalorder %s319_s27, %s556_s26  ;;  %p564_p8 = scmp.lt.s32.totalorder %s556_s26, %s556_s26 }
 0x1ac   : > { %p558_p10 = pnand %p557_p9, %p823_p7  ;;  %p565_p13 = por %p564_p8, %p563_p6 }
 0x1ae   : > { %p559_p3 = pneg %p558_p10 }
 0x1b0   : > { %p566_p1 = pnand %p565_p13, %p559_p3 }
 0x1b2   : > { %569 = shalt.err (!%p566_p1)
}
 0x1b3   : > { %s570_s18 = scalar_lea.hbm %s870_s3, 32 }
 0x1b4   : > { %p571_p2 = scmp.ne.s32.totalorder %s870_s3, %s570_s18  ;;  %p576_p5 = scmp.lt.u32.totalorder %s570_s18, %s870_s3 }
 0x1b6   : > { %p572_p12 = pnand %p571_p2, %p823_p7 }
 0x1b8   : > { %p573_p0 = pneg %p572_p12 }
 0x1ba   : > { %p578_p11 = pnand %p576_p5, %p573_p0 }
 0x1bc   : > { %581 = shalt.err (!%p578_p11)
}
 0x1bd   : > { %415 = dma.vmem_to_hbm [thread:$0]  (%p823_p7), %s319_s27, 32, %s870_s3, [#allocation5]  }
 0x1be   : > { %615 = dma.done.wait (%p823_p7), [#allocation5], 32  }
 0x1bf   : > { %617 = vsyncadd (%p823_p7), [#allocation5], 4294967264 }
 0x1c0 PF: > { %s18_s17 = sadd.s32 1, %s640_s17   ;;  %s886_s12 = smov %s624_s13 }
 0x1c1   : > { %p15_p4 = scmp.ge.s32.totalorder %s18_s17, 4   ;;  %s887_s13 = smov %s628_s14 }
 0x1c2   : > { %s888_s14 = smov %s773_s5  ;;  %s889_s15 = smov %s636_s16 }
 0x1c3   : > { %s890_s16 = smov %s892_s11  ;;  %17 = sbr.rel (!%p15_p4) target bundleno = 6 (0x6), region = 82 }
 0x1ca   :  { %331 = vsyncpa [#allocation4], 1 }
 0x1cb   :  { %333 = vsyncpa [#allocation4 + $0x1], 1 }
 0x1cc   :  { %334 = vsyncpa [#allocation7], 1 }
 0x1cd   :  { %335 = vsyncpa [#allocation5], 1 }
 0x1ce   :  { %337 = vsyncpa [#allocation5 + $0x1], 1 }

</bundles_post_ra>
